<compile_context>
chip_gen: v6e
topology: v6e:2x2x1
jax: 0.10.0
libtpu: 0.0.40
codegen_flags: <defaults>
</compile_context>

<pallas_src>
import jax
import jax.numpy as jnp
from jax.experimental import pallas as pl
from jax.experimental.pallas import tpu as pltpu

HIDDEN = 32
LANES = 128


# ----------------------------------------------------------------------------
# Fused kernel: SSE + MLP(+/-0.5) + analytic derivative + scalar combine.
# ----------------------------------------------------------------------------
def _fused_loss_kernel(scal_ref, x_ref, t_ref, w1_ref, b1_ref, w2t_ref, o_ref):
    lam = scal_ref[0]      # penalty strength
    inv_n = scal_ref[1]    # 1 / numel(inputs)
    b2 = scal_ref[2]       # output bias of the MLP

    # --- mean squared error term (VPU elementwise + one XLU reduce) --------
    d = x_ref[...] - t_ref[...]
    mse = jnp.sum(d * d) * inv_n

    # --- tiny 1 -> HIDDEN -> 1 tanh MLP at x in {-0.5, +0.5} ---------------
    # Pure VPU broadcast-multiply + lane reduce; the MXU is never touched.
    w1 = w1_ref[...]        # (1, H)
    b1 = b1_ref[...]        # (1, H)
    w2t = w2t_ref[...]      # (1, H)  == w2.T

    h_m = jnp.tanh(b1 - 0.5 * w1)          # hidden at x = -0.5
    h_p = jnp.tanh(b1 + 0.5 * w1)          # hidden at x = +0.5

    y_m = jnp.sum(h_m * w2t) + b2          # model(-0.5)
    y_p = jnp.sum(h_p * w2t) + b2          # model(+0.5)

    # analytic d(model)/dx = ((1 - h^2) * w1) @ w2  (matches torch.autograd)
    g = w1 * w2t
    dy_m = jnp.sum((1.0 - h_m * h_m) * g)  # derivative at x = -0.5
    dy_p = jnp.sum((1.0 - h_p * h_p) * g)  # derivative at x = +0.5

    penalty = (y_p - y_m) ** 2
    reg = (dy_m - dy_p) ** 2

    total = mse + lam * penalty + 100.0 * reg
    # Lane-dense scalar splat -> unmasked full-block store.
    o_ref[...] = total * jnp.ones_like(o_ref)


# ----------------------------------------------------------------------------
# CustomLoss.forward equivalent (single Pallas launch).
# ----------------------------------------------------------------------------
def custom_loss(inputs, targets, params, lam):
    w1, b1, w2, b2 = params
    n = inputs.size
    # Example is sized to be lane-divisible; pad in the wrapper for other sizes.
    assert n % LANES == 0, "input numel must be a multiple of 128"
    rows = n // LANES

    x2 = inputs.reshape(rows, LANES).astype(jnp.float32)
    t2 = targets.reshape(rows, LANES).astype(jnp.float32)
    w1v = w1.reshape(1, HIDDEN).astype(jnp.float32)
    b1v = b1.reshape(1, HIDDEN).astype(jnp.float32)
    w2t = w2.reshape(1, HIDDEN).astype(jnp.float32)   # (H,1) -> (1,H)

    scalars = jnp.stack([
        jnp.asarray(lam, jnp.float32).reshape(()),
        jnp.asarray(1.0 / n, jnp.float32).reshape(()),
        jnp.asarray(b2, jnp.float32).reshape(()),
    ])

    out = pl.pallas_call(
        _fused_loss_kernel,
        out_shape=jax.ShapeDtypeStruct((8, LANES), jnp.float32),
        in_specs=[
            pl.BlockSpec(memory_space=pltpu.MemorySpace.SMEM),   # scalars
            pl.BlockSpec(memory_space=pltpu.MemorySpace.VMEM),   # inputs slab
            pl.BlockSpec(memory_space=pltpu.MemorySpace.VMEM),   # targets slab
            pl.BlockSpec(memory_space=pltpu.MemorySpace.VMEM),   # w1
            pl.BlockSpec(memory_space=pltpu.MemorySpace.VMEM),   # b1
            pl.BlockSpec(memory_space=pltpu.MemorySpace.VMEM),   # w2^T
        ],
        out_specs=pl.BlockSpec(memory_space=pltpu.MemorySpace.VMEM),
        cost_estimate=pl.CostEstimate(
            flops=3 * n + 12 * HIDDEN,
            transcendentals=2 * HIDDEN,
            bytes_accessed=8 * n + 16 * HIDDEN,
        ),
    )(scalars, x2, t2, w1v, b1v, w2t)

    # Note: torch version returns a shape-(1,) tensor; we return a scalar.
    return out[0, 0]


# ----------------------------------------------------------------------------
# Pure-JAX reference (uses jax autodiff) to sanity-check the Pallas path.
# ----------------------------------------------------------------------------
def _model_ref(x, params):
    w1, b1, w2, b2 = params
    return jnp.tanh(x @ w1 + b1) @ w2 + b2


def _custom_loss_ref(inputs, targets, params, lam):
    mse = jnp.mean((inputs - targets) ** 2)
    p05 = _model_ref(jnp.array([[0.5]], jnp.float32), params)[0, 0]
    m05 = _model_ref(jnp.array([[-0.5]], jnp.float32), params)[0, 0]
    loss = mse + lam * (p05 - m05) ** 2
    dfun = jax.grad(lambda s: _model_ref(jnp.array([[s]], jnp.float32),
                                         params)[0, 0])
    der0 = dfun(-0.5)
    der1 = dfun(0.5)
    return loss + 100.0 * (der0 - der1) ** 2


if __name__ == "__main__":
    key = jax.random.PRNGKey(0)
    k1, k2, k3, k4, k5, k6 = jax.random.split(key, 6)

    # Deterministic synthetic model parameters (1 -> HIDDEN -> 1 tanh MLP).
    w1 = jax.random.normal(k1, (1, HIDDEN), jnp.float32) * 0.5
    b1 = jax.random.normal(k2, (1, HIDDEN), jnp.float32) * 0.1
    w2 = jax.random.normal(k3, (HIDDEN, 1), jnp.float32) * 0.5
    b2 = jax.random.normal(k4, (1, 1), jnp.float32) * 0.1
    params = (w1, b1, w2, b2)
    lam = 0.7

    # Inputs/targets, PyTorch NCHW layout.
    inputs = jax.random.normal(k5, (2, 4, 16, 16), jnp.float32)
    targets = jax.random.normal(k6, (2, 4, 16, 16), jnp.float32)

    loss = custom_loss(inputs, targets, params, lam)
    jax.block_until_ready(loss)

    ref = _custom_loss_ref(inputs, targets, params, lam)
    assert jnp.allclose(loss, ref, rtol=1e-4, atol=1e-5), (loss, ref)

    print("KERNEL_OK")
</pallas_src>

<mosaic_0001>
module attributes {stable_mosaic.version = 11 : i64} {
  func.func @_fused_loss_kernel(%arg0: memref<3xf32, #tpu.memory_space<smem>>, %arg1: memref<16x128xf32, #tpu.memory_space<vmem>>, %arg2: memref<16x128xf32, #tpu.memory_space<vmem>>, %arg3: memref<1x32xf32, #tpu.memory_space<vmem>>, %arg4: memref<1x32xf32, #tpu.memory_space<vmem>>, %arg5: memref<1x32xf32, #tpu.memory_space<vmem>>, %arg6: memref<8x128xf32, #tpu.memory_space<vmem>>) attributes {dimension_semantics = [], scalar_prefetch = 0 : i64, scratch_operands = 0 : i64, tpu.core_type = #tpu.core_type<tc>} {
    %c0 = arith.constant 0 : index
    %0 = memref.load %arg0[%c0] : memref<3xf32, #tpu.memory_space<smem>>
    %c1 = arith.constant 1 : index
    %1 = memref.load %arg0[%c1] : memref<3xf32, #tpu.memory_space<smem>>
    %c2 = arith.constant 2 : index
    %2 = memref.load %arg0[%c2] : memref<3xf32, #tpu.memory_space<smem>>
    %c0_0 = arith.constant 0 : index
    %c0_1 = arith.constant 0 : index
    %3 = vector.load %arg1[%c0_0, %c0_1] : memref<16x128xf32, #tpu.memory_space<vmem>>, vector<16x128xf32>
    %c0_2 = arith.constant 0 : index
    %c0_3 = arith.constant 0 : index
    %4 = vector.load %arg2[%c0_2, %c0_3] : memref<16x128xf32, #tpu.memory_space<vmem>>, vector<16x128xf32>
    %5 = arith.subf %3, %4 : vector<16x128xf32>
    %6 = arith.mulf %5, %5 : vector<16x128xf32>
    %7 = vector.shape_cast %6 : vector<16x128xf32> to vector<1x16x128xf32>
    %cst = arith.constant dense<0.000000e+00> : vector<1xf32>
    %8 = vector.multi_reduction <add>, %7, %cst [1, 2] : vector<1x16x128xf32> to vector<1xf32>
    %9 = vector.shape_cast %8 : vector<1xf32> to vector<1x1x1xf32>
    %10 = vector.extract %9[0, 0, 0] : f32 from vector<1x1x1xf32>
    %11 = arith.mulf %10, %1 : f32
    %c0_4 = arith.constant 0 : index
    %c0_5 = arith.constant 0 : index
    %12 = vector.load %arg3[%c0_4, %c0_5] : memref<1x32xf32, #tpu.memory_space<vmem>>, vector<1x32xf32>
    %c0_6 = arith.constant 0 : index
    %c0_7 = arith.constant 0 : index
    %13 = vector.load %arg4[%c0_6, %c0_7] : memref<1x32xf32, #tpu.memory_space<vmem>>, vector<1x32xf32>
    %c0_8 = arith.constant 0 : index
    %c0_9 = arith.constant 0 : index
    %14 = vector.load %arg5[%c0_8, %c0_9] : memref<1x32xf32, #tpu.memory_space<vmem>>, vector<1x32xf32>
    %cst_10 = arith.constant 5.000000e-01 : f32
    %15 = vector.broadcast %cst_10 : f32 to vector<1x32xf32>
    %16 = arith.mulf %15, %12 : vector<1x32xf32>
    %17 = arith.subf %13, %16 : vector<1x32xf32>
    %18 = math.tanh %17 : vector<1x32xf32>
    %cst_11 = arith.constant 5.000000e-01 : f32
    %19 = vector.broadcast %cst_11 : f32 to vector<1x32xf32>
    %20 = arith.mulf %19, %12 : vector<1x32xf32>
    %21 = arith.addf %13, %20 : vector<1x32xf32>
    %22 = math.tanh %21 : vector<1x32xf32>
    %23 = arith.mulf %18, %14 : vector<1x32xf32>
    %24 = vector.shape_cast %23 : vector<1x32xf32> to vector<1x1x32xf32>
    %cst_12 = arith.constant dense<0.000000e+00> : vector<1xf32>
    %25 = vector.multi_reduction <add>, %24, %cst_12 [1, 2] : vector<1x1x32xf32> to vector<1xf32>
    %26 = vector.shape_cast %25 : vector<1xf32> to vector<1x1x1xf32>
    %27 = vector.extract %26[0, 0, 0] : f32 from vector<1x1x1xf32>
    %28 = arith.addf %27, %2 : f32
    %29 = arith.mulf %22, %14 : vector<1x32xf32>
    %30 = vector.shape_cast %29 : vector<1x32xf32> to vector<1x1x32xf32>
    %cst_13 = arith.constant dense<0.000000e+00> : vector<1xf32>
    %31 = vector.multi_reduction <add>, %30, %cst_13 [1, 2] : vector<1x1x32xf32> to vector<1xf32>
    %32 = vector.shape_cast %31 : vector<1xf32> to vector<1x1x1xf32>
    %33 = vector.extract %32[0, 0, 0] : f32 from vector<1x1x1xf32>
    %34 = arith.addf %33, %2 : f32
    %35 = arith.mulf %12, %14 : vector<1x32xf32>
    %36 = arith.mulf %18, %18 : vector<1x32xf32>
    %cst_14 = arith.constant 1.000000e+00 : f32
    %37 = vector.broadcast %cst_14 : f32 to vector<1x32xf32>
    %38 = arith.subf %37, %36 : vector<1x32xf32>
    %39 = arith.mulf %38, %35 : vector<1x32xf32>
    %40 = vector.shape_cast %39 : vector<1x32xf32> to vector<1x1x32xf32>
    %cst_15 = arith.constant dense<0.000000e+00> : vector<1xf32>
    %41 = vector.multi_reduction <add>, %40, %cst_15 [1, 2] : vector<1x1x32xf32> to vector<1xf32>
    %42 = vector.shape_cast %41 : vector<1xf32> to vector<1x1x1xf32>
    %43 = vector.extract %42[0, 0, 0] : f32 from vector<1x1x1xf32>
    %44 = arith.mulf %22, %22 : vector<1x32xf32>
    %cst_16 = arith.constant 1.000000e+00 : f32
    %45 = vector.broadcast %cst_16 : f32 to vector<1x32xf32>
    %46 = arith.subf %45, %44 : vector<1x32xf32>
    %47 = arith.mulf %46, %35 : vector<1x32xf32>
    %48 = vector.shape_cast %47 : vector<1x32xf32> to vector<1x1x32xf32>
    %cst_17 = arith.constant dense<0.000000e+00> : vector<1xf32>
    %49 = vector.multi_reduction <add>, %48, %cst_17 [1, 2] : vector<1x1x32xf32> to vector<1xf32>
    %50 = vector.shape_cast %49 : vector<1xf32> to vector<1x1x1xf32>
    %51 = vector.extract %50[0, 0, 0] : f32 from vector<1x1x1xf32>
    %52 = arith.subf %34, %28 : f32
    %53 = arith.mulf %52, %52 : f32
    %54 = arith.subf %43, %51 : f32
    %55 = arith.mulf %54, %54 : f32
    %56 = arith.mulf %0, %53 : f32
    %57 = arith.addf %11, %56 : f32
    %cst_18 = arith.constant 1.000000e+02 : f32
    %58 = arith.mulf %cst_18, %55 : f32
    %59 = arith.addf %57, %58 : f32
    %cst_19 = arith.constant 1.000000e+00 : f32
    %60 = vector.broadcast %cst_19 : f32 to vector<8x128xf32>
    %61 = vector.broadcast %59 : f32 to vector<8x128xf32>
    %62 = arith.mulf %61, %60 : vector<8x128xf32>
    %c0_20 = arith.constant 0 : index
    %c0_21 = arith.constant 0 : index
    %63 = vector.load %arg6[%c0_20, %c0_21] : memref<8x128xf32, #tpu.memory_space<vmem>>, vector<8x128xf32>
    tpu.vector_store %arg6[%c0_20, %c0_21], %62 {strides = array<i32>} : memref<8x128xf32, #tpu.memory_space<vmem>>, vector<8x128xf32>,
    return
  }
}

</mosaic_0001>

<bundles_post_ra>
// kernel: tpu_custom_call.1
= control target key start
LH: loop header
LB: loop body
LE: loop exit
PB: predicated region body
PF: predicated region fallthrough
CT: control target
= control target key end

     0   :  { %11 = vsyncpa [#allocation5], 0  ;;  %s336_s0 = inlined_call_operand.hbm [shape: f32[3], index: 0, kind: input, shape index: {}]   ;;  %s337_s1 = inlined_call_operand.hbm [shape: f32[16,128], index: 1, kind: input, shape index: {}]   ;;  %s338_s2 = inlined_call_operand.hbm [shape: f32[16,128], index: 2, kind: input, shape index: {}]   ;;  %s339_s3 = inlined_call_operand.vmem [shape: f32[1,32], index: 3, kind: input, shape index: {}]   ;;  %s340_s4 = inlined_call_operand.vmem [shape: f32[1,32], index: 4, kind: input, shape index: {}]   ;;  %s341_s5 = inlined_call_operand.vmem [shape: f32[1,32], index: 5, kind: input, shape index: {}]   ;;  %s342_s6 = inlined_call_operand.hbm [shape: f32[8,128], index: 6, kind: output, shape index: {}]  }
   0x1   :  { %12 = vsyncpa [#allocation3], 0 }
   0x2   :  { %13 = vsyncpa [#allocation8], 0 }
   0x3   :  { %14 = vsyncpa [#allocation4], 0  ;;  %s270_s21 = smov [#allocation2]   ;;  %s271_s24 = smov [#allocation6]  }
   0x4   :  { %22 = dma.hbm_to_smem %s336_s0, 16, %s270_s21, [#allocation5]  }
   0x5   :  { %s28_s25 = sshll.u32 %s271_s24, 4  ;;  %s29_s25 = int_to_ptr.vmem [resolvable:$true] %s28_s25 }
   0x6   :  { %s210_s26 = scalar_lea.vmem %s29_s25, 256  ;;  %p215_p1 = scmp.lt.s32.totalorder %s29_s25, %s29_s25 }
   0x7   :  { %p211_p0 = scmp.ne.s32.totalorder %s29_s25, %s210_s26  ;;  %p216_p2 = scmp.lt.s32.totalorder %s210_s26, %s210_s26 }
   0x9   :  { %p217_p3 = por %p216_p2, %p215_p1 }
   0xb   :  { %p218_p4 = pnand %p217_p3, %p211_p0 }
   0xd   :  { %221 = shalt.err (!%p218_p4)
}
   0xe   :  { %s272_s27 = smov 128   ;;  %s273_s28 = smov 8  }
   0xf   :  { %34 = dma.hbm_to_vmem [thread:$0]  %s337_s1, 256, %s29_s25, [#allocation3], %s272_s27, %s272_s27, %s273_s28  }
  0x10   :  { %s274_s7 = smov [#allocation7]  }
  0x11   :  { %s40_s8 = sshll.u32 %s274_s7, 4  ;;  %s41_s8 = int_to_ptr.vmem [resolvable:$true] %s40_s8 }
  0x12   :  { %s230_s0 = scalar_lea.vmem %s41_s8, 256  ;;  %p235_p6 = scmp.lt.s32.totalorder %s41_s8, %s41_s8 }
  0x13   :  { %p231_p5 = scmp.ne.s32.totalorder %s41_s8, %s230_s0  ;;  %p236_p7 = scmp.lt.s32.totalorder %s230_s0, %s230_s0 }
  0x15   :  { %p237_p8 = por %p236_p7, %p235_p6 }
  0x17   :  { %p238_p9 = pnand %p237_p8, %p231_p5 }
  0x19   :  { %241 = shalt.err (!%p238_p9)
}
  0x1a   :  { %46 = dma.hbm_to_vmem [thread:$0]  %s338_s2, 256, %s41_s8, [#allocation8], %s272_s27, %s272_s27, %s273_s28  }
  0x1b   :  { %262 = dma.done.wait [#allocation5], 16  }
  0x1c   :  { %263 = vsyncadd [#allocation5], 4294967280 }
  0x1d   :  { %264 = dma.done.wait [#allocation3], 256  }
  0x1e   :  { %265 = vsyncadd [#allocation3], 4294967040 }
  0x1f   :  { %266 = dma.done.wait [#allocation8], 256  }
  0x20   :  { %267 = vsyncadd [#allocation8], 4294967040 }
  0x21   :  { %62 = sfence }
  0x22   :  { %v66_v0 = vld [vmem:[#allocation6] sm:$0xff]  ;;  %v67_v1 = vld [vmem:[#allocation6 + $0x8] sm:$0xff]  ;;  %v68_v2 = vld [vmem:[#allocation7] sm:$0xff]  ;;  %vm94_vm0 = vcmask 253952   ;;  %s63_s16 = sld [smem:[#allocation2]]  ;;  %s275_s30 = smov [#allocation9]  }
  0x23   :  { %v69_v3 = vld [vmem:[#allocation7 + $0x8] sm:$0xff]  ;;  %v70_v4 = vsub.f32 %v66_v0, %v68_v2  ;;  %v85_v5 = vld [vmem:[%s339_s3] sm:$0x1]  ;;  %s173_s3 = sld [smem:[#allocation2 + $0x2]]  ;;  %s161_s7 = sshll.u32 %s275_s30, 4  ;;  %s162_s7 = int_to_ptr.vmem [resolvable:$true] %s161_s7 }
  0x24   :  { %v86_v6 = vld [vmem:[%s340_s4] sm:$0x1]  ;;  %v71_v7 = vsub.f32 %v67_v1, %v69_v3  ;;  %v88_v8 = vmul.f32 0.5, %v85_v5  ;;  %s172_s4 = sld [smem:[#allocation2 + $0x1]]  ;;  %s242_s0 = scalar_lea.vmem %s162_s7, 128 }
  0x25   :  { %v72_v9 = vmul.f32 %v70_v4, %v70_v4  ;;  %v87_v14 = vld [vmem:[%s341_s5] sm:$0x1]  ;;  %p243_p10 = scmp.ne.s32.totalorder %s162_s7, %s242_s0  ;;  %p247_p11 = scmp.lt.s32.totalorder %s162_s7, %s162_s7 }
  0x26   :  { %v73_v10 = vmul.f32 %v71_v7, %v71_v7  ;;  %v91_v11 = vadd.f32 %v88_v8, %v86_v6  ;;  %v89_v12 = vsub.f32 %v86_v6, %v88_v8  ;;  %v118_v18 = vmul.f32 %v87_v14, %v85_v5  ;;  %p248_p12 = scmp.lt.s32.totalorder %s242_s0, %s242_s0 }
  0x28   :  { %v74_v13 = vadd.f32 %v73_v10, %v72_v9  ;;  %190 = vtanh.f32 %v91_v11  ;;  %p249_p13 = por %p248_p12, %p247_p11 }
  0x29   :  { %192 = vtanh.f32 %v89_v12 }
  0x2a   :  { %75 = vadd.xlane.f32.xlu0 %v74_v13  ;;  %p250_p0 = pnand %p249_p13, %p243_p10 }
  0x35   :  { %v191_v15 = vpop.eup %190 }
  0x36   :  { %v193_v16 = vpop.eup %192  ;;  %v106_v17 = vmul.f32 %v191_v15, %v87_v14  ;;  %v132_v19 = vmul.f32 %v191_v15, %v191_v15 }
  0x37   :  { %v93_v20 = vmul.f32 %v193_v16, %v87_v14  ;;  %v119_v21 = vmul.f32 %v193_v16, %v193_v16 }
  0x38   :  { %v107_v22 = vsel %vm94_vm0, %v106_v17, 0.0  ;;  %v133_v23 = vsub.f32 1.0, %v132_v19 }
  0x39   :  { %108 = vadd.xlane.f32.xlu1 %v107_v22  ;;  %v95_v24 = vsel %vm94_vm0, %v93_v20, 0.0  ;;  %v120_v25 = vsub.f32 1.0, %v119_v21 }
  0x3a   :  { %96 = vadd.xlane.f32.xlu0 %v95_v24  ;;  %v134_v26 = vmul.f32 %v133_v23, %v118_v18 }
  0x3b   :  { %v121_v27 = vmul.f32 %v120_v25, %v118_v18 }
  0x3c   :  { %v135_v28 = vsel %vm94_vm0, %v134_v26, 0.0 }
  0x3d   :  { %v122_v29 = vsel %vm94_vm0, %v121_v27, 0.0 }
  0x3e   :  { %123 = vadd.xlane.f32.xlu1 %v122_v29  ;;  %136 = vadd.xlane.f32.xlu0 %v135_v28 }
  0xb3   :  { %v76_v30 = vpop.xlane.xlu0 %75 }
  0xb4   :  { %v77_v31 = vrot.slane %v76_v30, 4 }
  0xb6   :  { %v78_v32 = vadd.f32 %v77_v31, %v76_v30 }
  0xb8   :  { %v79_v33 = vrot.slane %v78_v32, 2 }
  0xba   :  { %v80_v34 = vadd.f32 %v79_v33, %v78_v32 }
  0xbc   :  { %v81_v35 = vrot.slane %v80_v34, 1 }
  0xbe   :  { %v82_v36 = vadd.f32 %v81_v35, %v80_v34 }
  0xc0   :  { %174 = vpush %v82_v36 }
  0xc2   :  { %v109_v37 = vpop.xlane.xlu1 %108 }
  0xc3   :  { %v110_v38 = vrot.slane %v109_v37, 4  ;;  %v97_v39 = vpop.xlane.xlu0 %96 }
  0xc4   :  { %v98_v40 = vrot.slane %v97_v39, 4 }
  0xc5   :  { %v111_v41 = vadd.f32 %v110_v38, %v109_v37 }
  0xc6   :  { %v99_v42 = vadd.f32 %v98_v40, %v97_v39 }
  0xc7   :  { %v112_v43 = vrot.slane %v111_v41, 2  ;;  %v124_v44 = vpop.xlane.xlu1 %123  ;;  %v137_v45 = vpop.xlane.xlu0 %136 }
  0xc8   :  { %v100_v46 = vrot.slane %v99_v42, 2  ;;  %v125_v47 = vrot.slane %v124_v44, 4  ;;  %v138_v48 = vrot.slane %v137_v45, 4 }
  0xc9   :  { %v113_v49 = vadd.f32 %v112_v43, %v111_v41 }
  0xca   :  { %v126_v50 = vadd.f32 %v125_v47, %v124_v44  ;;  %v139_v51 = vadd.f32 %v138_v48, %v137_v45  ;;  %v101_v52 = vadd.f32 %v100_v46, %v99_v42 }
  0xcb   :  { %v114_v53 = vrot.slane %v113_v49, 1 }
  0xcc   :  { %v127_v54 = vrot.slane %v126_v50, 2  ;;  %v140_v55 = vrot.slane %v139_v51, 2  ;;  %v102_v56 = vrot.slane %v101_v52, 1 }
  0xcd   :  { %v115_v57 = vadd.f32 %v114_v53, %v113_v49 }
  0xce   :  { %v128_v58 = vadd.f32 %v127_v54, %v126_v50  ;;  %v141_v59 = vadd.f32 %v140_v55, %v139_v51  ;;  %v103_v60 = vadd.f32 %v102_v56, %v101_v52 }
  0xd0   :  { %176 = vpush %v103_v60  ;;  %v129_v61 = vrot.slane %v128_v58, 1  ;;  %v142_v62 = vrot.slane %v141_v59, 1 }
  0xd1   :  { %178 = vpush %v115_v57 }
  0xd2   :  { %v130_v63 = vadd.f32 %v129_v61, %v128_v58  ;;  %v143_v0 = vadd.f32 %v142_v62, %v141_v59 }
  0xd4   :  { %180 = vpush %v130_v63 }
  0xd5   :  { %182 = vpush %v143_v0 }
  0xf1   :  { %s175_s5 = spop %174 }
  0xf2   :  { %s84_s25 = smul.f32 %s175_s5, %s172_s4 }
 0x101   :  { %s177_s15 = spop %176 }
 0x102   :  { %s105_s17 = sadd.f32 %s177_s15, %s173_s3  ;;  %s179_s18 = spop %178 }
 0x103   :  { %s117_s19 = sadd.f32 %s179_s18, %s173_s3 }
 0x105   :  { %s145_s20 = ssub.f32 %s117_s19, %s105_s17  ;;  %s181_s21 = spop %180 }
 0x106   :  { %s183_s22 = spop %182 }
 0x107   :  { %s146_s23 = smul.f32 %s145_s20, %s145_s20  ;;  %s147_s24 = ssub.f32 %s181_s21, %s183_s22 }
 0x109   :  { %s149_s26 = smul.f32 %s146_s23, %s63_s16 }
 0x10a   :  { %s148_s27 = smul.f32 %s147_s24, %s147_s24 }
 0x10b   :  { %s150_s28 = sadd.f32 %s149_s26, %s84_s25 }
 0x10c   :  { %s151_s29 = smul.f32 100.0, %s148_s27 }
 0x10e   :  { %s152_s8 = sadd.f32 %s151_s29, %s150_s28 }
 0x110   :  { %v153_v1 = vstv %s152_s8 }
 0x111   :  { %154 = vst [vmem:[#allocation9] sm:$0xff] %v153_v1 }
 0x112   :  { %253 = shalt.err (!%p250_p0)
}
 0x113   :  { %164 = dma.vmem_to_hbm [thread:$0]  %s162_s7, 128, %s342_s6, [#allocation4]  }
 0x114   :  { %268 = dma.done.wait [#allocation4], 128  }
 0x115   :  { %269 = vsyncadd [#allocation4], 4294967168 }
 0x116   :  { %168 = vsyncpa [#allocation3], 1 }
 0x117   :  { %169 = vsyncpa [#allocation8], 1 }
 0x118   :  { %170 = vsyncpa [#allocation4], 1 }
 0x119   :  { %171 = vsyncpa [#allocation5], 1 }

</bundles_post_ra>
